<compile_context>
chip_gen: v5e
topology: v5e:2x2
jax: 0.10.0
libtpu: 0.0.40
codegen_flags: <defaults>
</compile_context>

<pallas_src>
import functools

import jax
import jax.numpy as jnp
from jax import lax
from jax.experimental import pallas as pl
from jax.experimental.pallas import tpu as pltpu


def embedding_kernel(ids_ref, tok_tbl_ref, pos_tbl_ref, out_ref, *, seq_len):
    """Fused token-row gather + positional add with dense (8, D) stores.

    ids_ref    : (padded_rows,) int32 in SMEM (scalar prefetch)
    tok_tbl_ref: (V, D) f32 VMEM, resident across the grid
    pos_tbl_ref: (L, D) f32 VMEM, resident across the grid
    out_ref    : (rows_per_step, D) f32 VMEM block of the flattened output
    """
    step = pl.program_id(0)
    rows, _ = out_ref.shape
    vocab = tok_tbl_ref.shape[0]
    row_base = step * rows
    n_groups = rows // 8

    def do_group(g, carry):
        group_start = pl.multiple_of(g * 8, 8)
        parts = []
        for i in range(8):                          # group-of-8 unroll
            r = row_base + group_start + i          # flat row index into (B*T, D)
            tok_id = ids_ref[r]                     # scalar read from SMEM
            # VMEM has no runtime OOB check: clamp instead of silently reading
            # a neighbouring allocation (PyTorch would raise on bad ids).
            tok_id = jnp.minimum(jnp.maximum(tok_id, 0), vocab - 1)
            pos_id = lax.rem(r, seq_len)            # position = flat row % T
            parts.append(tok_tbl_ref[pl.ds(tok_id, 1), :]
                         + pos_tbl_ref[pl.ds(pos_id, 1), :])
        tile = jnp.concatenate(parts, axis=0)       # (8, D) built in registers
        out_ref[pl.ds(group_start, 8), :] = tile    # single aligned dense store
        return carry

    lax.fori_loop(0, n_groups, do_group, 0)


def _choose_rows_per_step(total_rows, max_rows=512):
    """Largest multiple of 8 dividing `total_rows`, capped at `max_rows`,
    keeping >=2 grid steps when possible (v7x has 2 TensorCores)."""
    cap = min(max_rows, total_rows)
    if total_rows >= 16:
        cap = min(cap, total_rows // 2)
    best = 8
    r = 8
    while r <= cap:
        if total_rows % r == 0:
            best = r
        r += 8
    return best


def embedding_forward(x, tok_tbl, pos_tbl, *, max_rows_per_step=512):
    """x: (B, T) int token ids -> (B, T, D) float32 embeddings."""
    B, T = x.shape
    V, D = tok_tbl.shape
    L = pos_tbl.shape[0]
    assert T <= L, f"sequence length {T} exceeds max_token_length {L}"

    total = B * T
    padded_total = ((total + 7) // 8) * 8           # (8,128) block constraint
    rows_per_step = _choose_rows_per_step(padded_total, max_rows_per_step)
    grid = (padded_total // rows_per_step,)

    ids_flat = x.reshape(total).astype(jnp.int32)
    if padded_total != total:
        ids_flat = jnp.pad(ids_flat, (0, padded_total - total))

    kernel = functools.partial(embedding_kernel, seq_len=T)

    grid_spec = pltpu.PrefetchScalarGridSpec(
        num_scalar_prefetch=1,
        grid=grid,
        in_specs=[
            # Both tables stay resident in VMEM across the whole grid.
            pl.BlockSpec((V, D), lambda i, ids: (0, 0)),   # token table
            pl.BlockSpec((L, D), lambda i, ids: (0, 0)),   # position table
        ],
        out_specs=pl.BlockSpec((rows_per_step, D), lambda i, ids: (i, 0)),
    )

    out_flat = pl.pallas_call(
        kernel,
        out_shape=jax.ShapeDtypeStruct((padded_total, D), jnp.float32),
        grid_spec=grid_spec,
        compiler_params=pltpu.CompilerParams(
            dimension_semantics=("parallel",),
            # Default scoped VMEM limit (16/32 MiB) is far below physical on
            # v5e/v6e; raise it so resident tables + output tiles fit.
            vmem_limit_bytes=64 * 1024 * 1024,
        ),
    )(ids_flat, tok_tbl, pos_tbl)

    return out_flat[:total].reshape(B, T, D)


if __name__ == "__main__":
    # Module hyper-parameters (small, consistent with the PyTorch __init__).
    num_embeddings   = 64     # V
    embedding_dim    = 128    # D (lane-aligned)
    padding_idx      = 0
    max_token_length = 16     # L
    B, T = 2, 8

    key = jax.random.PRNGKey(0)
    k_tok, k_pos, k_ids = jax.random.split(key, 3)

    # nn.Embedding default init ~ N(0, 1); padding_idx row is zeroed (init-only
    # effect, forward pass is unchanged).
    tok_tbl = jax.random.normal(k_tok, (num_embeddings, embedding_dim), jnp.float32)
    tok_tbl = tok_tbl.at[padding_idx].set(0.0)
    pos_tbl = jax.random.normal(k_pos, (max_token_length, embedding_dim), jnp.float32)

    x = jax.random.randint(k_ids, (B, T), 0, num_embeddings, dtype=jnp.int32)
    x = x.at[0, 0].set(padding_idx)   # exercise the padding row too

    out = embedding_forward(x, tok_tbl, pos_tbl)
    out = jax.block_until_ready(out)

    # Pure-JAX reference of the PyTorch forward.
    ref = tok_tbl[x] + pos_tbl[jnp.arange(T)][None, :, :]
    assert out.shape == (B, T, embedding_dim) and out.dtype == jnp.float32
    assert jnp.allclose(out, ref, atol=1e-6, rtol=1e-6)

    print("KERNEL_OK")
</pallas_src>

<mosaic_0001>
module attributes {stable_mosaic.version = 11 : i64} {
  func.func @embedding_kernel(%arg0: i32, %arg1: memref<16xi32, #tpu.memory_space<smem>>, %arg2: memref<64x128xf32, #tpu.memory_space<vmem>>, %arg3: memref<16x128xf32, #tpu.memory_space<vmem>>, %arg4: memref<8x128xf32, #tpu.memory_space<vmem>>) attributes {dimension_semantics = [#tpu.dimension_semantics<parallel>], iteration_bounds = array<i64: 2>, scalar_prefetch = 1 : i64, scratch_operands = 0 : i64, tpu.core_type = #tpu.core_type<tc>, window_params = [{pipeline_mode = #tpu.pipeline_mode<synchronous>, transform_indices = @transform_0, window_bounds = array<i64: 64, 128>}, {pipeline_mode = #tpu.pipeline_mode<synchronous>, transform_indices = @transform_1, window_bounds = array<i64: 16, 128>}, {transform_indices = @transform_2, window_bounds = array<i64: 8, 128>}]} {
    %c8_i32 = arith.constant 8 : i32
    %0 = arith.muli %arg0, %c8_i32 : i32
    %c0_i32 = arith.constant 0 : i32
    %c8_i32_0 = arith.constant 8 : i32
    %1 = arith.muli %c0_i32, %c8_i32_0 : i32
    %2 = tpu.assume_multiple %1, 8 : i32
    %3 = arith.addi %0, %2 : i32
    %c0_i32_1 = arith.constant 0 : i32
    %4 = arith.addi %3, %c0_i32_1 : i32
    %5 = arith.index_cast %4 : i32 to index
    %6 = memref.load %arg1[%5] : memref<16xi32, #tpu.memory_space<smem>>
    %c0_i32_2 = arith.constant 0 : i32
    %7 = arith.maxsi %6, %c0_i32_2 : i32
    %c63_i32 = arith.constant 63 : i32
    %8 = arith.minsi %7, %c63_i32 : i32
    %c8_i32_3 = arith.constant 8 : i32
    %9 = arith.remsi %4, %c8_i32_3 : i32
    %10 = arith.index_cast %8 : i32 to index
    %c0 = arith.constant 0 : index
    %11 = vector.load %arg2[%10, %c0] : memref<64x128xf32, #tpu.memory_space<vmem>>, vector<1x128xf32>
    %12 = arith.index_cast %9 : i32 to index
    %c0_4 = arith.constant 0 : index
    %13 = vector.load %arg3[%12, %c0_4] : memref<16x128xf32, #tpu.memory_space<vmem>>, vector<1x128xf32>
    %14 = arith.addf %11, %13 : vector<1x128xf32>
    %15 = arith.addi %0, %2 : i32
    %c1_i32 = arith.constant 1 : i32
    %16 = arith.addi %15, %c1_i32 : i32
    %17 = arith.index_cast %16 : i32 to index
    %18 = memref.load %arg1[%17] : memref<16xi32, #tpu.memory_space<smem>>
    %c0_i32_5 = arith.constant 0 : i32
    %19 = arith.maxsi %18, %c0_i32_5 : i32
    %c63_i32_6 = arith.constant 63 : i32
    %20 = arith.minsi %19, %c63_i32_6 : i32
    %c8_i32_7 = arith.constant 8 : i32
    %21 = arith.remsi %16, %c8_i32_7 : i32
    %22 = arith.index_cast %20 : i32 to index
    %c0_8 = arith.constant 0 : index
    %23 = vector.load %arg2[%22, %c0_8] : memref<64x128xf32, #tpu.memory_space<vmem>>, vector<1x128xf32>
    %24 = arith.index_cast %21 : i32 to index
    %c0_9 = arith.constant 0 : index
    %25 = vector.load %arg3[%24, %c0_9] : memref<16x128xf32, #tpu.memory_space<vmem>>, vector<1x128xf32>
    %26 = arith.addf %23, %25 : vector<1x128xf32>
    %27 = arith.addi %0, %2 : i32
    %c2_i32 = arith.constant 2 : i32
    %28 = arith.addi %27, %c2_i32 : i32
    %29 = arith.index_cast %28 : i32 to index
    %30 = memref.load %arg1[%29] : memref<16xi32, #tpu.memory_space<smem>>
    %c0_i32_10 = arith.constant 0 : i32
    %31 = arith.maxsi %30, %c0_i32_10 : i32
    %c63_i32_11 = arith.constant 63 : i32
    %32 = arith.minsi %31, %c63_i32_11 : i32
    %c8_i32_12 = arith.constant 8 : i32
    %33 = arith.remsi %28, %c8_i32_12 : i32
    %34 = arith.index_cast %32 : i32 to index
    %c0_13 = arith.constant 0 : index
    %35 = vector.load %arg2[%34, %c0_13] : memref<64x128xf32, #tpu.memory_space<vmem>>, vector<1x128xf32>
    %36 = arith.index_cast %33 : i32 to index
    %c0_14 = arith.constant 0 : index
    %37 = vector.load %arg3[%36, %c0_14] : memref<16x128xf32, #tpu.memory_space<vmem>>, vector<1x128xf32>
    %38 = arith.addf %35, %37 : vector<1x128xf32>
    %39 = arith.addi %0, %2 : i32
    %c3_i32 = arith.constant 3 : i32
    %40 = arith.addi %39, %c3_i32 : i32
    %41 = arith.index_cast %40 : i32 to index
    %42 = memref.load %arg1[%41] : memref<16xi32, #tpu.memory_space<smem>>
    %c0_i32_15 = arith.constant 0 : i32
    %43 = arith.maxsi %42, %c0_i32_15 : i32
    %c63_i32_16 = arith.constant 63 : i32
    %44 = arith.minsi %43, %c63_i32_16 : i32
    %c8_i32_17 = arith.constant 8 : i32
    %45 = arith.remsi %40, %c8_i32_17 : i32
    %46 = arith.index_cast %44 : i32 to index
    %c0_18 = arith.constant 0 : index
    %47 = vector.load %arg2[%46, %c0_18] : memref<64x128xf32, #tpu.memory_space<vmem>>, vector<1x128xf32>
    %48 = arith.index_cast %45 : i32 to index
    %c0_19 = arith.constant 0 : index
    %49 = vector.load %arg3[%48, %c0_19] : memref<16x128xf32, #tpu.memory_space<vmem>>, vector<1x128xf32>
    %50 = arith.addf %47, %49 : vector<1x128xf32>
    %51 = arith.addi %0, %2 : i32
    %c4_i32 = arith.constant 4 : i32
    %52 = arith.addi %51, %c4_i32 : i32
    %53 = arith.index_cast %52 : i32 to index
    %54 = memref.load %arg1[%53] : memref<16xi32, #tpu.memory_space<smem>>
    %c0_i32_20 = arith.constant 0 : i32
    %55 = arith.maxsi %54, %c0_i32_20 : i32
    %c63_i32_21 = arith.constant 63 : i32
    %56 = arith.minsi %55, %c63_i32_21 : i32
    %c8_i32_22 = arith.constant 8 : i32
    %57 = arith.remsi %52, %c8_i32_22 : i32
    %58 = arith.index_cast %56 : i32 to index
    %c0_23 = arith.constant 0 : index
    %59 = vector.load %arg2[%58, %c0_23] : memref<64x128xf32, #tpu.memory_space<vmem>>, vector<1x128xf32>
    %60 = arith.index_cast %57 : i32 to index
    %c0_24 = arith.constant 0 : index
    %61 = vector.load %arg3[%60, %c0_24] : memref<16x128xf32, #tpu.memory_space<vmem>>, vector<1x128xf32>
    %62 = arith.addf %59, %61 : vector<1x128xf32>
    %63 = arith.addi %0, %2 : i32
    %c5_i32 = arith.constant 5 : i32
    %64 = arith.addi %63, %c5_i32 : i32
    %65 = arith.index_cast %64 : i32 to index
    %66 = memref.load %arg1[%65] : memref<16xi32, #tpu.memory_space<smem>>
    %c0_i32_25 = arith.constant 0 : i32
    %67 = arith.maxsi %66, %c0_i32_25 : i32
    %c63_i32_26 = arith.constant 63 : i32
    %68 = arith.minsi %67, %c63_i32_26 : i32
    %c8_i32_27 = arith.constant 8 : i32
    %69 = arith.remsi %64, %c8_i32_27 : i32
    %70 = arith.index_cast %68 : i32 to index
    %c0_28 = arith.constant 0 : index
    %71 = vector.load %arg2[%70, %c0_28] : memref<64x128xf32, #tpu.memory_space<vmem>>, vector<1x128xf32>
    %72 = arith.index_cast %69 : i32 to index
    %c0_29 = arith.constant 0 : index
    %73 = vector.load %arg3[%72, %c0_29] : memref<16x128xf32, #tpu.memory_space<vmem>>, vector<1x128xf32>
    %74 = arith.addf %71, %73 : vector<1x128xf32>
    %75 = arith.addi %0, %2 : i32
    %c6_i32 = arith.constant 6 : i32
    %76 = arith.addi %75, %c6_i32 : i32
    %77 = arith.index_cast %76 : i32 to index
    %78 = memref.load %arg1[%77] : memref<16xi32, #tpu.memory_space<smem>>
    %c0_i32_30 = arith.constant 0 : i32
    %79 = arith.maxsi %78, %c0_i32_30 : i32
    %c63_i32_31 = arith.constant 63 : i32
    %80 = arith.minsi %79, %c63_i32_31 : i32
    %c8_i32_32 = arith.constant 8 : i32
    %81 = arith.remsi %76, %c8_i32_32 : i32
    %82 = arith.index_cast %80 : i32 to index
    %c0_33 = arith.constant 0 : index
    %83 = vector.load %arg2[%82, %c0_33] : memref<64x128xf32, #tpu.memory_space<vmem>>, vector<1x128xf32>
    %84 = arith.index_cast %81 : i32 to index
    %c0_34 = arith.constant 0 : index
    %85 = vector.load %arg3[%84, %c0_34] : memref<16x128xf32, #tpu.memory_space<vmem>>, vector<1x128xf32>
    %86 = arith.addf %83, %85 : vector<1x128xf32>
    %87 = arith.addi %0, %2 : i32
    %c7_i32 = arith.constant 7 : i32
    %88 = arith.addi %87, %c7_i32 : i32
    %89 = arith.index_cast %88 : i32 to index
    %90 = memref.load %arg1[%89] : memref<16xi32, #tpu.memory_space<smem>>
    %c0_i32_35 = arith.constant 0 : i32
    %91 = arith.maxsi %90, %c0_i32_35 : i32
    %c63_i32_36 = arith.constant 63 : i32
    %92 = arith.minsi %91, %c63_i32_36 : i32
    %c8_i32_37 = arith.constant 8 : i32
    %93 = arith.remsi %88, %c8_i32_37 : i32
    %94 = arith.index_cast %92 : i32 to index
    %c0_38 = arith.constant 0 : index
    %95 = vector.load %arg2[%94, %c0_38] : memref<64x128xf32, #tpu.memory_space<vmem>>, vector<1x128xf32>
    %96 = arith.index_cast %93 : i32 to index
    %c0_39 = arith.constant 0 : index
    %97 = vector.load %arg3[%96, %c0_39] : memref<16x128xf32, #tpu.memory_space<vmem>>, vector<1x128xf32>
    %98 = arith.addf %95, %97 : vector<1x128xf32>
    %99 = tpu.concatenate %14, %26, %38, %50, %62, %74, %86, %98 in 0 : vector<1x128xf32>, vector<1x128xf32>, vector<1x128xf32>, vector<1x128xf32>, vector<1x128xf32>, vector<1x128xf32>, vector<1x128xf32>, vector<1x128xf32> -> vector<8x128xf32>
    %100 = arith.index_cast %2 : i32 to index
    %c0_40 = arith.constant 0 : index
    %101 = vector.load %arg4[%100, %c0_40] : memref<8x128xf32, #tpu.memory_space<vmem>>, vector<8x128xf32>
    tpu.vector_store %arg4[%100, %c0_40], %99 {strides = array<i32>} : memref<8x128xf32, #tpu.memory_space<vmem>>, vector<8x128xf32>,
    %c1_i32_41 = arith.constant 1 : i32
    return
  }
  func.func @transform_0(%arg0: i32, %arg1: memref<16xi32, #tpu.memory_space<smem>>) -> (i32, i32) {
    %c0_i32 = arith.constant 0 : i32
    %c0_i32_0 = arith.constant 0 : i32
    %c0_i32_1 = arith.constant 0 : i32
    return %c0_i32, %c0_i32_0 : i32, i32
  }
  func.func @transform_1(%arg0: i32, %arg1: memref<16xi32, #tpu.memory_space<smem>>) -> (i32, i32) {
    %c0_i32 = arith.constant 0 : i32
    %c0_i32_0 = arith.constant 0 : i32
    %c0_i32_1 = arith.constant 0 : i32
    return %c0_i32, %c0_i32_0 : i32, i32
  }
  func.func @transform_2(%arg0: i32, %arg1: memref<16xi32, #tpu.memory_space<smem>>) -> (i32, i32) {
    %c0_i32 = arith.constant 0 : i32
    %c0_i32_0 = arith.constant 0 : i32
    return %arg0, %c0_i32 : i32, i32
  }
}

</mosaic_0001>

<bundles_post_ra>
// kernel: tpu_custom_call.1
= control target key start
LH: loop header
LB: loop body
LE: loop exit
PB: predicated region body
PF: predicated region fallthrough
CT: control target
= control target key end

     0   :  { %s725_s15 = smov [#allocation3]   ;;  %s949_s0 = inlined_call_operand.hbm [shape: s32[16], index: 0, kind: input, shape index: {}]   ;;  %s950_s1 = inlined_call_operand.hbm [shape: f32[64,128], index: 1, kind: input, shape index: {}]   ;;  %s951_s2 = inlined_call_operand.hbm [shape: f32[16,128], index: 2, kind: input, shape index: {}]   ;;  %s952_s3 = inlined_call_operand.hbm [shape: f32[16,128], index: 3, kind: output, shape index: {}]  }
   0x1   :  { %953 = sst [smem:[#allocation15_spill]] %s950_s1  ;;  %s9_s14 = sshll.u32 %s949_s0, 4  ;;  %s10_s14 = int_to_ptr.hbm [resolvable:$true] %s9_s14 }
   0x2   :  { %954 = sst [smem:[#allocation16_spill]] %s951_s2 }
   0x3   :  { %12 = dma.hbm_to_smem %s10_s14, 16, %s725_s15, [#allocation2] }
   0x4   :  { %695 = dma.done.wait [#allocation2], 16 }
   0x5   :  { %696 = vsyncadd [#allocation2], 4294967280 }
   0x6   :  { %15 = sfence }
   0x7   :  { %16 = vsyncpa [#allocation5], 0 }
   0x8   :  { %17 = vsyncpa [#allocation8], 0 }
   0x9   :  { %18 = vsyncpa [#allocation6], 0 }
   0xa   :  { %20 = vsyncpa [#allocation6 + $0x1], 0  ;;  %s753_s16 = smov 0   ;;  %s755_s17 = smov 0  }
   0xb   :  { %s757_s18 = smov 0   ;;  %s759_s19 = smov 0  }
   0xc LB: > { %s774_s0 = sadd.s32 4294967295, %s723_s19   ;;  %s439_s20 = sadd.s32 4294967294, %s723_s19   ;;  %s723_s19 = sphi %s759_s19, %s967_s19   ;;  %s719_s18 = sphi %s757_s18, %s966_s18   ;;  %s715_s17 = sphi %s755_s17, %s965_s17   ;;  %s711_s16 = sphi %s753_s16, %s964_s16  }
   0xd   : > { %s778_s21 = sadd.s32 1, %s723_s19   ;;  %s75_s22 = sadd.s32 1, %s719_s18 }
   0xe   : > { %s72_s23 = ssub.s32 %s723_s19, %s778_s21  ;;  %p85_p0 = scmp.ne.s32.totalorder %s719_s18, %s715_s17 }
   0xf   : > { %p73_p1 = scmp.eq.s32.totalorder %s72_s23, 0  ;;  %p86_p2 = scmp.eq.s32.totalorder %s774_s0, 1 }
  0x10   : > { %p91_p3 = scmp.ne.s32.totalorder %s715_s17, %s711_s16  ;;  %p92_p4 = scmp.eq.s32.totalorder %s439_s20, 1 }
  0x11   : > { %s789_s24 = scalar_select %p73_p1, %s719_s18, %s75_s22  }
  0x12   : > { %p791_p5 = por %p86_p2, %p85_p0  ;;  %p795_p6 = por %p92_p4, %p91_p3 }
  0x13   : > { %955 = sst [smem:[#allocation14_spill]] %s789_s24  ;;  %p440_p7 = scmp.ge.s32.totalorder %s723_s19, 1 }
  0x14   : > { %p99_p8 = scmp.lt.s32.totalorder %s723_s19, 3  ;;  %p537_p9 = scmp.eq.s32.totalorder %s774_s0, 0 }
  0x15   : > { %s959_s1 = sld [smem:[#allocation15_spill]]  ;;  %s726_s4 = smov [#allocation4]  }
  0x16   : > { %p802_p10 = pnand %p440_p7, %p99_p8  ;;  %s112_s5 = sshll.u32 %s726_s4, 4  ;;  %s113_s5 = int_to_ptr.vmem [resolvable:$true] %s112_s5 }
  0x17   : > { %s960_s2 = sld [smem:[#allocation16_spill]]  ;;  %s727_s9 = smov 128  }
  0x18   : > { %p526_p11 = pneg %p802_p10  ;;  %s728_s10 = smov 8  }
  0x19   : > { %s729_s11 = smov [#allocation7]  }
  0x1a   : > { %p527_p12 = pnand %p537_p9, %p526_p11  ;;  %s126_s12 = sshll.u32 %s729_s11, 4  ;;  %s127_s12 = int_to_ptr.vmem [resolvable:$true] %s126_s12 }
  0x1b   : > { %s110_s30 = sshll.u32 %s959_s1, 4  ;;  %142 = sbr.rel (%p802_p10) target bundleno = 108 (0x6c), region = 28  ;;  %s111_s30 = int_to_ptr.hbm [resolvable:$true] %s110_s30 }
  0x1c   : > { %529 = dma.hbm_to_vmem [thread:$0]  (!%p527_p12), %s111_s30, 1024, %s113_s5, [#allocation5], %s727_s9, %s727_s9, %s728_s10  }
  0x1d   : > { %s124_s8 = sshll.u32 %s960_s2, 4  ;;  %s125_s8 = int_to_ptr.hbm [resolvable:$true] %s124_s8 }
  0x1e   : > { %532 = dma.hbm_to_vmem [thread:$0]  (!%p527_p12), %s125_s8, 256, %s127_s12, [#allocation8], %s727_s9, %s727_s9, %s728_s10  }
  0x20   : > { %698 = dma.done.wait (%p537_p9), [#allocation5], 1024  }
  0x21   : > { %700 = vsyncadd (%p537_p9), [#allocation5], 4294966272 }
  0x22   : > { %702 = dma.done.wait (%p537_p9), [#allocation8], 256  }
  0x23   : > { %704 = vsyncadd (%p537_p9), [#allocation8], 4294967040  ;;  %s827_s13 = sshll.u32 %s774_s0, 3  ;;  %vm323_vm0 = vcmask 1040384   ;;  %vm325_vm1 = vcmask 1041408   ;;  %vm327_vm2 = vcmask 1042432  }
  0x24   : > { %s167_s14 = sld [smem:[#allocation3 + %s827_s13]]  ;;  %p172_p13 = scmp.lt.s32.totalorder %s827_s13, 0  ;;  %vm329_vm3 = vcmask 1043456   ;;  %vm331_vm4 = vcmask 1044480   ;;  %vm333_vm5 = vcmask 1045504   ;;  %vm335_vm6 = vcmask 1046528  }
  0x25   : > { %s173_s20 = ssub.s32 0, %s827_s13  ;;  %s183_s22 = sadd.s32 1, %s827_s13 }
  0x26   : > { %s453_s23 = smin.u32 %s827_s13, %s173_s20  ;;  %s184_s27 = sld [smem:[#allocation3 + %s183_s22]] }
  0x27   : > { %s175_s28 = sand.u32 7, %s453_s23   ;;  %p189_p0 = scmp.lt.s32.totalorder %s183_s22, 0 }
  0x28   : > { %s176_s29 = ssub.s32 0, %s175_s28  ;;  %s190_s30 = ssub.s32 0, %s183_s22 }
  0x29   : > { %s969_s29 = smov (!%p172_p13, %s176_s29), %s175_s28  ;;  %s459_s4 = smin.u32 %s190_s30, %s183_s22 }
  0x2a   : > { %p168_p1 = scmp.gt.s32.totalorder %s167_s14, 0  ;;  %p448_p2 = scmp.lt.s32.totalorder %s167_s14, 63 }
  0x2b   : > { %s200_s5 = sadd.s32 2, %s827_s13  ;;  %s192_s6 = sand.u32 7, %s459_s4  }
  0x2c   : > { %s971_s14 = smov (!%p168_p1, %s167_s14), 0  ;;  %p185_p3 = scmp.gt.s32.totalorder %s184_s27, 0 }
  0x2d   : > { %s973_s14 = smov (!%p448_p2, %s971_s14), 63  ;;  %p454_p4 = scmp.lt.s32.totalorder %s184_s27, 63 }
  0x2e   : > { %s186_s0 = scalar_select %p185_p3, %s184_s27, 0 }
  0x2f   : > { %s201_s7 = sld [smem:[#allocation3 + %s200_s5]]  ;;  %s193_s8 = ssub.s32 0, %s192_s6 }
  0x30   : > { %s975_s0 = smov (!%p454_p4, %s186_s0), 63  ;;  %s977_s8 = smov (!%p189_p0, %s193_s8), %s192_s6 }
  0x31   : > { %p206_p7 = scmp.lt.s32.totalorder %s200_s5, 0  ;;  %s207_s9 = ssub.s32 0, %s200_s5 }
  0x32   : > { %s465_s10 = smin.u32 %s207_s9, %s200_s5  ;;  %s217_s12 = sadd.s32 3, %s827_s13 }
  0x33   : > { %s209_s11 = sand.u32 7, %s465_s10   ;;  %s218_s23 = sld [smem:[#allocation3 + %s217_s12]] }
  0x34   : > { %s210_s20 = ssub.s32 0, %s209_s11  ;;  %p223_p10 = scmp.lt.s32.totalorder %s217_s12, 0 }
  0x35   : > { %p202_p8 = scmp.gt.s32.totalorder %s201_s7, 0  ;;  %p460_p9 = scmp.lt.s32.totalorder %s201_s7, 63 }
  0x36   : > { %s981_s20 = smov (!%p206_p7, %s210_s20), %s209_s11  ;;  %s224_s27 = ssub.s32 0, %s217_s12 }
  0x37   : > { %s979_s7 = smov (!%p202_p8, %s201_s7), 0  ;;  %s471_s22 = smin.u32 %s224_s27, %s217_s12 }
  0x38   : > { %s983_s7 = smov (!%p460_p9, %s979_s7), 63  ;;  %s234_s28 = sadd.s32 4, %s827_s13 }
  0x39   : > { %p219_p11 = scmp.gt.s32.totalorder %s218_s23, 0  ;;  %p466_p12 = scmp.lt.s32.totalorder %s218_s23, 63 }
  0x3a   : > { %s226_s30 = sand.u32 7, %s471_s22   ;;  %s235_s4 = sld [smem:[#allocation3 + %s234_s28]] }
  0x3b   : > { %s985_s23 = smov (!%p219_p11, %s218_s23), 0  ;;  %s227_s5 = ssub.s32 0, %s226_s30 }
  0x3c   : > { %s987_s23 = smov (!%p466_p12, %s985_s23), 63  ;;  %p240_p13 = scmp.lt.s32.totalorder %s234_s28, 0 }
  0x3d   : > { %s989_s5 = smov (!%p223_p10, %s227_s5), %s226_s30  ;;  %s241_s6 = ssub.s32 0, %s234_s28 }
  0x3e   : > { %s477_s9 = smin.u32 %s241_s6, %s234_s28  ;;  %s856_s11 = sadd.s32 5, %s827_s13 }
  0x3f   : > { %s243_s10 = sand.u32 7, %s477_s9   ;;  %s252_s27 = sld [smem:[#allocation3 + %s856_s11]] }
  0x40   : > { %p236_p0 = scmp.gt.s32.totalorder %s235_s4, 0  ;;  %p472_p1 = scmp.lt.s32.totalorder %s235_s4, 63 }
  0x41   : > { %s244_s12 = ssub.s32 0, %s243_s10  ;;  %p257_p2 = scmp.lt.s32.totalorder %s856_s11, 0 }
  0x42   : > { %s991_s4 = smov (!%p236_p0, %s235_s4), 0  ;;  %s995_s12 = smov (!%p240_p13, %s244_s12), %s243_s10 }
  0x43   : > { %s993_s4 = smov (!%p472_p1, %s991_s4), 63  ;;  %s258_s22 = ssub.s32 0, %s856_s11 }
  0x44   : > { %s483_s28 = smin.u32 %s258_s22, %s856_s11  ;;  %s867_s30 = sadd.s32 6, %s827_s13 }
  0x45   : > { %p253_p3 = scmp.gt.s32.totalorder %s252_s27, 0  ;;  %p478_p4 = scmp.lt.s32.totalorder %s252_s27, 63 }
  0x46   : > { %s195_s6 = scalar_lea.vmem [#allocation4], %s975_s0  ;;  %s197_s9 = scalar_lea.vmem [#allocation7], %s977_s8 }
  0x47   : > { %v196_v0 = vld [vmem:[%s195_s6] sm:$0x1]  ;;  %s260_s10 = sand.u32 7, %s483_s28   ;;  %s872_s15 = sld [smem:[#allocation3 + %s867_s30]] }
  0x48   : > { %v198_v1 = vld [vmem:[%s197_s9] sm:$0x1]  ;;  %s254_s1 = scalar_select %p253_p3, %s252_s27, 0 }
  0x49   : > { %s261_s22 = ssub.s32 0, %s260_s10  ;;  %p274_p7 = scmp.lt.s32.totalorder %s867_s30, 0  ;;  %v199_v2 = vadd.f32 %v198_v1, %v196_v0 }
  0x4a   : > { %s212_s2 = scalar_lea.vmem [#allocation4], %s983_s7  ;;  %s214_s24 = scalar_lea.vmem [#allocation7], %s981_s20 }
  0x4b   : > { %v213_v3 = vld [vmem:[%s212_s2] sm:$0x1]  ;;  %s997_s1 = smov (!%p478_p4, %s254_s1), 63  ;;  %s178_s0 = scalar_lea.vmem [#allocation4], %s973_s14  ;;  %v303_v11 = vrot.slane %v199_v2, 7 }
  0x4c   : > { %v215_v4 = vld [vmem:[%s214_s24] sm:$0x1]  ;;  %s180_s8 = scalar_lea.vmem [#allocation7], %s969_s29  ;;  %s999_s22 = smov (!%p257_p2, %s261_s22), %s260_s10 }
  0x4d   : > { %v179_v5 = vld [vmem:[%s178_s0] sm:$0x1]  ;;  %s275_s28 = ssub.s32 0, %s867_s30  ;;  %v216_v7 = vadd.f32 %v215_v4, %v213_v3  ;;  %s229_s2 = scalar_lea.vmem [#allocation4], %s987_s23 }
  0x4e   : > { %v181_v6 = vld [vmem:[%s180_s8] sm:$0x1]  ;;  %s231_s24 = scalar_lea.vmem [#allocation7], %s989_s5  ;;  %p270_p8 = scmp.gt.s32.totalorder %s872_s15, 0 }
  0x4f   : > { %v230_v8 = vld [vmem:[%s229_s2] sm:$0x1]  ;;  %v182_v10 = vadd.f32 %v181_v6, %v179_v5  ;;  %p484_p9 = scmp.lt.s32.totalorder %s872_s15, 63  ;;  %s489_s14 = smin.u32 %s275_s28, %s867_s30  ;;  %v306_v15 = vrot.slane %v216_v7, 6 }
  0x50   : > { %v232_v9 = vld [vmem:[%s231_s24] sm:$0x1]  ;;  %s1001_s15 = smov (!%p270_p8, %s872_s15), 0  ;;  %s246_s29 = scalar_lea.vmem [#allocation4], %s993_s4 }
  0x51   : > { %v233_v12 = vadd.f32 %v232_v9, %v230_v8  ;;  %v247_v13 = vld [vmem:[%s246_s29] sm:$0x1]  ;;  %s248_s7 = scalar_lea.vmem [#allocation7], %s995_s12  ;;  %s277_s20 = sand.u32 7, %s489_s14   ;;  %v324_v16 = vsel %vm323_vm0, %v182_v10, %v303_v11 }
  0x52   : > { %v249_v14 = vld [vmem:[%s248_s7] sm:$0x1]  ;;  %s896_s23 = sadd.s32 7, %s827_s13  ;;  %s1003_s15 = smov (!%p484_p9, %s1001_s15), 63  ;;  %v326_v21 = vsel %vm325_vm1, %v324_v16, %v306_v15 }
  0x53   : > { %s278_s5 = ssub.s32 0, %s277_s20  ;;  %s899_s11 = sld [smem:[#allocation3 + %s896_s23]]  ;;  %v250_v17 = vadd.f32 %v249_v14, %v247_v13  ;;  %v309_v20 = vrot.slane %v233_v12, 5 }
  0x54   : > { %s263_s4 = scalar_lea.vmem [#allocation4], %s997_s1  ;;  %s265_s12 = scalar_lea.vmem [#allocation7], %s999_s22 }
  0x55   : > { %v264_v18 = vld [vmem:[%s263_s4] sm:$0x1]  ;;  %s1005_s5 = smov (!%p274_p7, %s278_s5), %s277_s20  ;;  %s292_s27 = ssub.s32 0, %s896_s23  ;;  %v312_v25 = vrot.slane %v250_v17, 4  ;;  %v328_v26 = vsel %vm327_vm2, %v326_v21, %v309_v20 }
  0x56   : > { %v266_v19 = vld [vmem:[%s265_s12] sm:$0x1]  ;;  %s961_s6 = sand.u32 1, %s715_s17   ;;  %s280_s10 = scalar_lea.vmem [#allocation4], %s1003_s15 }
  0x57   : > { %s908_s9 = sshll.u32 %s961_s6, 3  ;;  %v267_v22 = vadd.f32 %v266_v19, %v264_v18  ;;  %v281_v23 = vld [vmem:[%s280_s10] sm:$0x1]  ;;  %s282_s1 = scalar_lea.vmem [#allocation7], %s1005_s5  ;;  %v330_v29 = vsel %vm329_vm3, %v328_v26, %v312_v25 }
  0x58   : > { %v283_v24 = vld [vmem:[%s282_s1] sm:$0x1]  ;;  %s495_s0 = smin.u32 %s292_s27, %s896_s23  ;;  %p291_p10 = scmp.lt.s32.totalorder %s896_s23, 0 }
  0x59   : > { %s294_s30 = sand.u32 7, %s495_s0   ;;  %p287_p11 = scmp.gt.s32.totalorder %s899_s11, 0  ;;  %v284_v27 = vadd.f32 %v283_v24, %v281_v23  ;;  %v315_v28 = vrot.slane %v267_v22, 3 }
  0x5a   : > { %p490_p12 = scmp.lt.s32.totalorder %s899_s11, 63  ;;  %s295_s22 = ssub.s32 0, %s294_s30 }
  0x5b   : > { %s1007_s11 = smov (!%p287_p11, %s899_s11), 0  ;;  %s1009_s22 = smov (!%p291_p10, %s295_s22), %s294_s30  ;;  %v318_v30 = vrot.slane %v284_v27, 2  ;;  %v332_v32 = vsel %vm331_vm4, %v330_v29, %v315_v28 }
  0x5c   : > { %s1011_s11 = smov (!%p490_p12, %s1007_s11), 63  ;;  %s349_s28 = scalar_lea.hbm %s952_s3, %s827_s13 }
  0x5d   : > { %s299_s2 = scalar_lea.vmem [#allocation7], %s1009_s22  ;;  %s297_s24 = scalar_lea.vmem [#allocation4], %s1011_s11  ;;  %v334_v35 = vsel %vm333_vm5, %v332_v32, %v318_v30 }
  0x5e   : > { %v300_v31 = vld [vmem:[%s299_s2] sm:$0x1]  ;;  %s164_s14 = scalar_lea.vmem [#allocation9], %s908_s9  ;;  %s353_s7 = sshll.u32 %s349_s28, 4  ;;  %s354_s7 = int_to_ptr.hbm [resolvable:$true] %s353_s7 }
  0x5f   : > { %v298_v33 = vld [vmem:[%s297_s24] sm:$0x1]  ;;  %s351_s29 = sshll.u32 %s164_s14, 4  ;;  %s962_s13 = smov %s961_s6  ;;  %s352_s29 = int_to_ptr.vmem [resolvable:$true] %s351_s29 }
  0x60   : > { %v301_v34 = vadd.f32 %v300_v31, %v298_v33  ;;  %s339_s20 = scalar_lea.sflag [#allocation6], %s962_s13  ;;  %s665_s23 = sshra.s32 %s354_s7, 4  ;;  %s666_s23 = int_to_ptr.hbm [resolvable:$true] %s665_s23 }
  0x61   : > { %s667_s5 = scalar_lea.hbm %s666_s23, 8  ;;  %s671_s12 = scalar_lea.hbm %s952_s3, 16 }
  0x62   : > { %v321_v36 = vrot.slane %v301_v34, 1  ;;  %p668_p13 = scmp.ne.s32.totalorder %s666_s23, %s667_s5  ;;  %p672_p2 = scmp.lt.s32.totalorder %s666_s23, %s952_s3 }
  0x63   : > { %p673_p3 = scmp.lt.s32.totalorder %s671_s12, %s667_s5 }
  0x64   : > { %v336_v37 = vsel %vm335_vm6, %v334_v35, %v321_v36  ;;  %p669_p0 = pnand %p668_p13, %p791_p5 }
  0x65   : > { %337 = vst [vmem:[%s164_s14] sm:$0xff] %v336_v37  ;;  %p674_p4 = por %p673_p3, %p672_p2 }
  0x66   : > { %p670_p1 = pneg %p669_p0 }
  0x68   : > { %p675_p7 = pnand %p674_p4, %p670_p1 }
  0x6a   : > { %678 = shalt.err (!%p675_p7)
}
  0x6b   : > { %524 = dma.vmem_to_hbm [thread:$0]  (%p791_p5), %s352_s29, 128, %s354_s7, %s339_s20  }
  0x6c PF: > { %p541_p8 = scmp.ge.s32.totalorder %s723_s19, 2  ;;  %s365_s9 = sand.u32 1, %s711_s16  }
  0x6d   : > { %s366_s10 = scalar_lea.sflag [#allocation6], %s365_s9 }
  0x6e   : > { %p534_p9 = pnand %p541_p8, %p795_p6 }
  0x70   : > { %p535_p10 = pneg %p534_p9 }
  0x72   : > { %706 = dma.done.wait (%p535_p10), %s366_s10, 128  }
  0x73   : > { %708 = vsyncadd (%p535_p10), %s366_s10, 4294967168  ;;  %s963_s1 = sld [smem:[#allocation14_spill]]  ;;  %p23_p11 = scmp.ge.s32.totalorder %s778_s21, 4  }
  0x74   : > { %s964_s16 = smov %s715_s17  ;;  %s965_s17 = smov %s719_s18 }
  0x75   : > { %s967_s19 = smov %s778_s21  ;;  %25 = sbr.rel (!%p23_p11) target bundleno = 12 (0xc), region = 85 }
  0x79   : > { %s966_s18 = smov %s963_s1 }
  0x7a   :  { %372 = vsyncpa [#allocation5], 1 }
  0x7b   :  { %374 = vsyncpa [#allocation5 + $0x1], 1 }
  0x7c   :  { %375 = vsyncpa [#allocation8], 1 }
  0x7d   :  { %376 = vsyncpa [#allocation6], 1 }
  0x7e   :  { %378 = vsyncpa [#allocation6 + $0x1], 1 }

</bundles_post_ra>
